<compile_context>
chip_gen: v6e
topology: v6e:2x2x1
jax: 0.10.0
libtpu: 0.0.40
codegen_flags: <defaults>
</compile_context>

<pallas_src>
import jax
import jax.numpy as jnp
from jax.experimental import pallas as pl
from jax.experimental.pallas import tpu as pltpu

_LANE = 128
_VMEM_BUDGET = 24 * 1024 * 1024        # double-buffered in+out block budget (bytes)
_TARGET_STEP_BYTES = 2 * 1024 * 1024   # amortize ~0.35 us per-grid-step overhead
_VMEM_LIMIT = 48 * 1024 * 1024         # scoped VMEM limit (<= v7x 64 MiB / TC)


def _round_up(a, m):
    return ((a + m - 1) // m) * m


def _largest_divisor_leq(n, cap):
    cap = max(1, min(n, cap))
    for d in range(cap, 0, -1):
        if n % d == 0:
            return d
    return 1


# ----------------------------------------------------------------------------
# Kernel bodies
# ----------------------------------------------------------------------------
def _make_flat_kernel(b_blk, compute_dtype):
    def kernel(x_ref, w_ref, b_ref, o_ref):
        # x_ref: (b_blk, Cin, tl)   w_ref: (4*Cout, Cin)   b_ref: (4*Cout, 1)
        # o_ref: (b_blk, 4*Cout, tl)
        w = w_ref[...]
        bias = b_ref[...]
        for b in range(b_blk):  # unrolled 2-D MXU dots (jnp.dot is not batched)
            x = x_ref[b]
            if compute_dtype is not None:
                x = x.astype(compute_dtype)      # cast in-kernel, hidden under DMA
            acc = jnp.dot(w, x, preferred_element_type=jnp.float32)
            o_ref[b] = (acc + bias).astype(o_ref.dtype)
    return kernel


def _make_fused_kernel(th, L, compute_dtype):
    def kernel(x_ref, w_ref, b_ref, o_ref):
        # x_ref: (1, Cin, th*L)       lane-expanded rows (each x pixel duplicated)
        # w_ref: (2, 2, Cout, Cin)    [kh, kw, co, ci]
        # b_ref: (Cout, 1)
        # o_ref: (1, Cout, th, 2, L)  NCHW-view output block   (L = 2*W)
        x = x_ref[0]
        if compute_dtype is not None:
            x = x.astype(compute_dtype)
        bias = b_ref[...]
        col = jax.lax.broadcasted_iota(jnp.int32, (1, x.shape[-1]), 1)
        is_even = (col % 2) == 0                 # kw parity along the lane axis
        for kh in range(2):
            y_even = jnp.dot(w_ref[kh, 0], x, preferred_element_type=jnp.float32)
            y_odd = jnp.dot(w_ref[kh, 1], x, preferred_element_type=jnp.float32)
            y = (jnp.where(is_even, y_even, y_odd) + bias).astype(o_ref.dtype)
            for i in range(th):                  # 128-aligned static lane slices
                o_ref[0, :, i, kh, :] = y[:, i * L:(i + 1) * L]
    return kernel


# ----------------------------------------------------------------------------
# Tile selection (VMEM-aware, per-step byte target, >=2 parallel steps)
# ----------------------------------------------------------------------------
def _flat_tiles(N, Cin, Cout, HW):
    row_bytes = 4 * (Cin + 4 * Cout)             # f32 in+out bytes per lane per batch elem
    max_tl = max(_LANE, (_VMEM_BUDGET // (2 * row_bytes)) // _LANE * _LANE)
    tl = min(max_tl, min(_round_up(HW, _LANE), 8192))
    tl = max(_LANE, (tl // _LANE) * _LANE)
    want_b = _TARGET_STEP_BYTES // max(1, tl * row_bytes)
    want_b = min(want_b, _VMEM_BUDGET // max(1, 2 * tl * row_bytes))
    b_blk = _largest_divisor_leq(N, max(1, int(want_b)))
    HWp = _round_up(HW, tl)
    # keep >=2 grid steps on a parallel axis (v7x has 2 TensorCores)
    if (N // b_blk) * (HWp // tl) < 2:
        if N >= 2:
            b_blk = _largest_divisor_leq(N, max(1, N // 2))
        elif HW > _LANE:
            tl = max(_LANE, _round_up(pl.cdiv(HW, 2), _LANE))
    HWp = _round_up(HW, tl)
    return b_blk, tl, HWp


def _fused_tiles(N, Cin, Cout, H, W):
    L = 2 * W
    row_bytes = 4 * L * (Cin + 2 * Cout)          # expanded-x in + NCHW out per input row
    max_th = max(1, _VMEM_BUDGET // (2 * row_bytes))
    max_th = min(max_th, 32)                      # bound the unrolled store loop
    want_th = max(1, _TARGET_STEP_BYTES // row_bytes)
    th = _largest_divisor_leq(H, min(max_th, want_th))
    if N * (H // th) < 2 and H > 1:               # >=2 steps for v7x megacore
        th = _largest_divisor_leq(H, max(1, H // 2))
    return th, L


# ----------------------------------------------------------------------------
# Wrappers
# ----------------------------------------------------------------------------
def _upconv_flat(x_nchw, weight, bias, compute_dtype, out_dtype):
    N, Cin, H, W = x_nchw.shape
    Cout = weight.shape[1]
    HW = H * W
    b_blk, tl, HWp = _flat_tiles(N, Cin, Cout, HW)

    # NCHW -> (N, Cin, H*W) is a free reshape (no transpose glue).
    x_flat = x_nchw.reshape(N, Cin, HW)
    if HWp != HW:
        x_flat = jnp.pad(x_flat, ((0, 0), (0, 0), (0, HWp - HW)))

    # weight: (Cin, Cout, 2, 2) -> (4*Cout, Cin), row r = co*4 + kh*2 + kw.
    w_mat = jnp.transpose(weight, (1, 2, 3, 0)).reshape(4 * Cout, Cin)
    if compute_dtype is not None:
        w_mat = w_mat.astype(compute_dtype)       # weight is tiny; x is cast in-kernel
    b_col = jnp.repeat(bias, 4).reshape(4 * Cout, 1).astype(jnp.float32)

    grid = (N // b_blk, HWp // tl)
    cost = pl.CostEstimate(
        flops=2 * N * 4 * Cout * Cin * HW,
        transcendentals=0,
        bytes_accessed=4 * N * HWp * (Cin + 4 * Cout) + 4 * (4 * Cout * Cin + 4 * Cout),
    )
    out_rows = pl.pallas_call(
        _make_flat_kernel(b_blk, compute_dtype),
        out_shape=jax.ShapeDtypeStruct((N, 4 * Cout, HWp), out_dtype),
        grid_spec=pltpu.PrefetchScalarGridSpec(
            num_scalar_prefetch=0,
            grid=grid,
            in_specs=[
                pl.BlockSpec((b_blk, Cin, tl), lambda bi, j: (bi, 0, j)),
                pl.BlockSpec((4 * Cout, Cin), lambda bi, j: (0, 0)),
                pl.BlockSpec((4 * Cout, 1), lambda bi, j: (0, 0)),
            ],
            out_specs=pl.BlockSpec((b_blk, 4 * Cout, tl), lambda bi, j: (bi, 0, j)),
        ),
        compiler_params=pltpu.CompilerParams(
            dimension_semantics=("parallel", "parallel"),
            vmem_limit_bytes=_VMEM_LIMIT,
        ),
        cost_estimate=cost,
    )(x_flat, w_mat, b_col)

    # XLA depth-to-space epilogue (fallback path only).
    y = out_rows[:, :, :HW] if HWp != HW else out_rows
    y = y.reshape(N, Cout, 2, 2, H, W)
    y = jnp.transpose(y, (0, 1, 4, 2, 5, 3))      # (N, Cout, H, 2, W, 2)
    return y.reshape(N, Cout, 2 * H, 2 * W)


def _upconv_fused(x_nchw, weight, bias, compute_dtype, out_dtype):
    N, Cin, H, W = x_nchw.shape
    Cout = weight.shape[1]
    th, L = _fused_tiles(N, Cin, Cout, H, W)

    # Duplicate each input pixel along W (xr[..., c] = x[..., c//2]) so the
    # in-kernel kw interleave becomes a lane-parity select (no lane shuffles).
    xr = jnp.repeat(x_nchw, 2, axis=-1).reshape(N, Cin, H * L)

    # weight: (Cin, Cout, 2, 2) -> (2, 2, Cout, Cin) = [kh, kw, co, ci]
    w_b = jnp.transpose(weight, (2, 3, 1, 0))
    if compute_dtype is not None:
        w_b = w_b.astype(compute_dtype)
    b_col = bias.reshape(Cout, 1).astype(jnp.float32)

    grid = (N, H // th)
    cost = pl.CostEstimate(
        flops=2 * N * 4 * Cout * Cin * H * L,     # parity halves discarded by the select
        transcendentals=0,
        bytes_accessed=4 * N * H * L * (Cin + 2 * Cout) + 4 * (4 * Cout * Cin + Cout),
    )
    out5 = pl.pallas_call(
        _make_fused_kernel(th, L, compute_dtype),
        out_shape=jax.ShapeDtypeStruct((N, Cout, H, 2, L), out_dtype),
        grid_spec=pltpu.PrefetchScalarGridSpec(
            num_scalar_prefetch=0,
            grid=grid,
            in_specs=[
                pl.BlockSpec((1, Cin, th * L), lambda n, j: (n, 0, j)),
                pl.BlockSpec((2, 2, Cout, Cin), lambda n, j: (0, 0, 0, 0)),
                pl.BlockSpec((Cout, 1), lambda n, j: (0, 0)),
            ],
            out_specs=pl.BlockSpec((1, Cout, th, 2, L), lambda n, j: (n, 0, j, 0, 0)),
        ),
        compiler_params=pltpu.CompilerParams(
            dimension_semantics=("parallel", "parallel"),
            vmem_limit_bytes=_VMEM_LIMIT,
        ),
        cost_estimate=cost,
    )(xr, w_b, b_col)

    # (N, Cout, H, 2, 2W) -> (N, Cout, 2H, 2W) is a pure (free) reshape.
    return out5.reshape(N, Cout, 2 * H, 2 * W)


def upconv_pallas(x_nchw, weight, bias, *, compute_dtype=None, out_dtype=None,
                  fuse_depth_to_space=None):
    """ConvTranspose2d(kernel_size=2, stride=2) forward.

    x_nchw : (N, Cin, H, W)
    weight : (Cin, Cout, 2, 2)   (PyTorch ConvTranspose2d layout)
    bias   : (Cout,)
    returns: (N, Cout, 2H, 2W)
    """
    N, Cin, H, W = x_nchw.shape
    Cout = weight.shape[1]
    out_dtype = x_nchw.dtype if out_dtype is None else out_dtype

    if fuse_depth_to_space is None:
        # Fused path needs lane-dense 2W; its 2x-expanded input read is a net
        # traffic win when Cin <= 2*Cout (the usual UpConv channel ratio).
        fuse_depth_to_space = (W % 64 == 0) and (Cin <= 2 * Cout)

    if fuse_depth_to_space and W % 64 == 0:
        return _upconv_fused(x_nchw, weight, bias, compute_dtype, out_dtype)
    return _upconv_flat(x_nchw, weight, bias, compute_dtype, out_dtype)


def upconv_reference(x_nchw, weight, bias):
    """Pure-JAX reference of ConvTranspose2d(k=2, s=2) for validation."""
    N, Cin, H, W = x_nchw.shape
    Cout = weight.shape[1]
    y = jnp.einsum("nchw,cokl->nohwkl", x_nchw, weight)
    y = jnp.transpose(y, (0, 1, 2, 4, 3, 5)).reshape(N, Cout, 2 * H, 2 * W)
    return y + bias[None, :, None, None]


if __name__ == "__main__":
    key = jax.random.PRNGKey(0)
    k_x, k_w, k_b, k_x2 = jax.random.split(key, 4)

    # 1) Small shape from the module spec: N=2, Cin=4, H=W=16, Cout=8
    #    (W % 64 != 0 -> exercises the flat fallback path).
    N, Cin, H, W, Cout = 2, 4, 16, 16, 8
    fan = Cin * 2 * 2
    bound = 1.0 / (fan ** 0.5)
    x = jax.random.normal(k_x, (N, Cin, H, W), dtype=jnp.float32)
    weight = jax.random.uniform(k_w, (Cin, Cout, 2, 2), jnp.float32, -bound, bound)
    bias = jax.random.uniform(k_b, (Cout,), jnp.float32, -bound, bound)

    out = jax.block_until_ready(upconv_pallas(x, weight, bias))
    ref = upconv_reference(x, weight, bias)
    assert out.shape == (N, Cout, 2 * H, 2 * W)
    assert jnp.allclose(out, ref, atol=1e-5, rtol=1e-5), "flat path mismatch"

    # 2) Lane-dense shape (W % 64 == 0) -> exercises the fused NCHW-direct path.
    N2, H2, W2 = 1, 8, 64
    x2 = jax.random.normal(k_x2, (N2, Cin, H2, W2), dtype=jnp.float32)
    out2 = jax.block_until_ready(upconv_pallas(x2, weight, bias))
    ref2 = upconv_reference(x2, weight, bias)
    assert out2.shape == (N2, Cout, 2 * H2, 2 * W2)
    assert jnp.allclose(out2, ref2, atol=1e-5, rtol=1e-5), "fused path mismatch"

    print("KERNEL_OK")
</pallas_src>

<mosaic_0001>
module attributes {stable_mosaic.version = 11 : i64} {
  func.func @kernel(%arg0: i32, %arg1: i32, %arg2: memref<1x4x256xf32, #tpu.memory_space<vmem>>, %arg3: memref<32x4xf32, #tpu.memory_space<vmem>>, %arg4: memref<32x1xf32, #tpu.memory_space<vmem>>, %arg5: memref<1x32x256xf32, #tpu.memory_space<vmem>>) attributes {dimension_semantics = [#tpu.dimension_semantics<parallel>, #tpu.dimension_semantics<parallel>], iteration_bounds = array<i64: 2, 1>, scalar_prefetch = 0 : i64, scratch_operands = 0 : i64, tpu.core_type = #tpu.core_type<tc>, window_params = [{transform_indices = @transform_0, window_bounds = array<i64: 1, 4, 256>}, {pipeline_mode = #tpu.pipeline_mode<synchronous>, transform_indices = @transform_1, window_bounds = array<i64: 32, 4>}, {pipeline_mode = #tpu.pipeline_mode<synchronous>, transform_indices = @transform_2, window_bounds = array<i64: 32, 1>}, {transform_indices = @transform_3, window_bounds = array<i64: 1, 32, 256>}]} {
    %c0 = arith.constant 0 : index
    %c0_0 = arith.constant 0 : index
    %0 = vector.load %arg3[%c0, %c0_0] : memref<32x4xf32, #tpu.memory_space<vmem>>, vector<32x4xf32>
    %c0_1 = arith.constant 0 : index
    %c0_2 = arith.constant 0 : index
    %1 = vector.load %arg4[%c0_1, %c0_2] : memref<32x1xf32, #tpu.memory_space<vmem>>, vector<32x1xf32>
    %c0_3 = arith.constant 0 : index
    %c0_4 = arith.constant 0 : index
    %c0_5 = arith.constant 0 : index
    %2 = vector.load %arg2[%c0_3, %c0_4, %c0_5] : memref<1x4x256xf32, #tpu.memory_space<vmem>>, vector<1x4x256xf32>
    %3 = vector.shape_cast %2 : vector<1x4x256xf32> to vector<4x256xf32>
    %cst = arith.constant dense<0.000000e+00> : vector<32x256xf32>
    %4 = tpu.matmul %0, %3, %cst {dimension_numbers = #tpu.dot_dimension_numbers<[1], [0], [0], [1], [0, 0, 1, 1], [], []>} : vector<32x4xf32>, vector<4x256xf32>, vector<32x256xf32> -> vector<32x256xf32>
    %5 = vector.broadcast %1 : vector<32x1xf32> to vector<32x256xf32>
    %6 = arith.addf %4, %5 : vector<32x256xf32>
    %c0_6 = arith.constant 0 : index
    %c0_7 = arith.constant 0 : index
    %c0_8 = arith.constant 0 : index
    %7 = vector.load %arg5[%c0_6, %c0_7, %c0_8] : memref<1x32x256xf32, #tpu.memory_space<vmem>>, vector<1x32x256xf32>
    %8 = vector.shape_cast %7 : vector<1x32x256xf32> to vector<32x256xf32>
    %9 = vector.shape_cast %6 : vector<32x256xf32> to vector<1x32x256xf32>
    tpu.vector_store %arg5[%c0_6, %c0_7, %c0_8], %9 {strides = array<i32>} : memref<1x32x256xf32, #tpu.memory_space<vmem>>, vector<1x32x256xf32>,
    return
  }
  func.func @transform_0(%arg0: i32, %arg1: i32) -> (i32, i32, i32) {
    %c0_i32 = arith.constant 0 : i32
    %c0_i32_0 = arith.constant 0 : i32
    return %arg0, %c0_i32, %arg1 : i32, i32, i32
  }
  func.func @transform_1(%arg0: i32, %arg1: i32) -> (i32, i32) {
    %c0_i32 = arith.constant 0 : i32
    %c0_i32_0 = arith.constant 0 : i32
    %c0_i32_1 = arith.constant 0 : i32
    return %c0_i32, %c0_i32_0 : i32, i32
  }
  func.func @transform_2(%arg0: i32, %arg1: i32) -> (i32, i32) {
    %c0_i32 = arith.constant 0 : i32
    %c0_i32_0 = arith.constant 0 : i32
    %c0_i32_1 = arith.constant 0 : i32
    return %c0_i32, %c0_i32_0 : i32, i32
  }
  func.func @transform_3(%arg0: i32, %arg1: i32) -> (i32, i32, i32) {
    %c0_i32 = arith.constant 0 : i32
    %c0_i32_0 = arith.constant 0 : i32
    return %arg0, %c0_i32, %arg1 : i32, i32, i32
  }
}

</mosaic_0001>

<bundles_post_ra>
// kernel: tpu_custom_call.1
= control target key start
LH: loop header
LB: loop body
LE: loop exit
PB: predicated region body
PF: predicated region fallthrough
CT: control target
= control target key end

     0   :  { %8 = vsyncpa [#allocation3], 0  ;;  %s771_s0 = inlined_call_operand.vmem [shape: f32[2,4,256], index: 0, kind: input, shape index: {}]   ;;  %s772_s1 = inlined_call_operand.vmem [shape: f32[32,4], index: 1, kind: input, shape index: {}]   ;;  %s773_s2 = inlined_call_operand.vmem [shape: f32[32,1], index: 2, kind: input, shape index: {}]   ;;  %s774_s3 = inlined_call_operand.hbm [shape: f32[2,32,256], index: 3, kind: output, shape index: {}]  }
   0x1   :  { %10 = vsyncpa [#allocation3 + $0x1], 0  ;;  %s629_s12 = smov 0   ;;  %s631_s13 = smov 0  }
   0x2   :  { %s633_s14 = smov 0   ;;  %s635_s15 = smov 0  }
   0x3   :  { %s637_s16 = smov 0   ;;  %s639_s17 = smov 0  }
   0x4 LB: > { %s441_s18 = sadd.s32 4294967295, %s602_s17   ;;  %s442_s19 = sadd.s32 4294967294, %s602_s17   ;;  %s602_s17 = sphi %s639_s17, %s16_s17   ;;  %s598_s16 = sphi %s637_s16, %s781_s16   ;;  %s594_s15 = sphi %s635_s15, %s780_s15   ;;  %s590_s14 = sphi %s633_s14, %s779_s14   ;;  %s586_s13 = sphi %s631_s13, %s778_s13   ;;  %s582_s12 = sphi %s629_s12, %s777_s12  }
   0x5   : > { %s28_s20 = sadd.s32 1, %s598_s16  ;;  %s107_s21 = sadd.s32 1, %s590_s14 }
   0x6   : > { %p30_p0 = scmp.ge.s32.totalorder %s28_s20, 2  ;;  %p117_p1 = scmp.ne.s32.totalorder %s590_s14, %s586_s13 }
   0x7   : > { %p118_p2 = scmp.eq.s32.totalorder %s441_s18, 1  ;;  %p123_p3 = scmp.ne.s32.totalorder %s586_s13, %s582_s12 }
   0x8   : > { %s783_s20 = smov (%p30_p0, %s28_s20), 0  ;;  %p124_p5 = scmp.eq.s32.totalorder %s442_s19, 1 }
   0x9   : > { %p669_p4 = por %p118_p2, %p117_p1  ;;  %s102_s23 = ssub.s32 %s598_s16, %s783_s20 }
   0xa   : > { %p445_p6 = scmp.ge.s32.totalorder %s602_s17, 1  ;;  %p105_p7 = scmp.eq.s32.totalorder %s102_s23, 0 }
   0xb   : > { %p676_p8 = por %p124_p5, %p123_p3  ;;  %p161_p9 = scmp.lt.s32.totalorder %s602_s17, 3 }
   0xc   : > { %s682_s25 = scalar_select %p105_p7, %s590_s14, %s107_s21  }
   0xd   : > { %p162_p10 = pnand %p445_p6, %p161_p9 }
   0xe   : > { %p190_p11 = scmp.lt.s32.totalorder (!%p162_p10), %s594_s15, 1  ;;  %s186_s30 = sand.u32 (!%p162_p10), 1, %s586_s13  }
   0xf   : > { %165 = sbr.rel (%p162_p10) target bundleno = 245 (0xf5), region = 32  ;;  %s461_s6 = sshll.u32 (!%p162_p10), %s594_s15, 10 }
  0x10   : > { %s720_s10 = scalar_lea.hbm (!%p162_p10), %s774_s3, %s461_s6  ;;  %s606_s18 = smov (!%p162_p10), [#allocation2]  }
  0x11   : > { %s530_s19 = sshll.u32 (!%p162_p10), %s606_s18, 4  ;;  %s531_s19 = int_to_ptr.vmem [resolvable:$false] %s530_s19 }
  0x12   : > { %s532_s21 = scalar_lea.vmem (!%p162_p10), %s531_s19, 2048 }
  0x14   : > { %v604_v0 = vmov 0.0   ;;  %v206_v1 = vld [vmem:[%s773_s2 + $0x10] sm:$0xff]  ;;  %s191_s28 = scalar_select %p190_p11, %s594_s15, 1  ;;  %v605_v2 = vmov 0   ;;  %v204_v3 = vld [vmem:[%s773_s2] sm:$0xff]  ;;  %v207_v4 = vld [vmem:[%s773_s2 + $0x18] sm:$0xff] }
  0x15   : > { %313 = vmatprep.mubr.f32.mxu0 %v604_v0  ;;  %325 = vmatprep.mubr.f32.mxu1 %v604_v0  ;;  %v205_v5 = vld [vmem:[%s773_s2 + $0x8] sm:$0xff]  ;;  %vm244_vm0 = vcmask 1043456   ;;  %v200_v8 = vld [vmem:[%s772_s1] sm:$0xff]  ;;  %vm231_vm1 = vcmask 31744   ;;  %v202_v9 = vld [vmem:[%s772_s1 + $0x10] sm:$0xff]  ;;  %s726_s15 = scalar_lea.sflag [#allocation3], %s186_s30 }
  0x16   : > { %524 = vset.pattern.permute.xlu1 %v605_v2  ;;  %523 = vset.pattern.permute.xlu0 %v605_v2  ;;  %s460_s4 = sshll.u32 %s191_s28, 3  ;;  %v201_v10 = vld [vmem:[%s772_s1 + $0x8] sm:$0xff]  ;;  %v203_v11 = vld [vmem:[%s772_s1 + $0x18] sm:$0xff] }
  0x17   : > { %221 = vperm.xlu1 %524, %v206_v1   ;;  %211 = vperm.xlu0 %523, %v204_v3   ;;  %s197_s11 = scalar_lea.vmem %s771_s0, %s460_s4  ;;  %s446_s4 = sshll.u32 %s186_s30, 6 }
  0x18   : > { %v208_v6 = vld [vmem:[%s197_s11] sm:$0xff]  ;;  %s188_s5 = scalar_lea.vmem [#allocation2], %s446_s4 }
  0x19   : > { %v230_v7 = vcombine.high %v208_v6, %v208_v6  ;;  %s362_s7 = sshll.u32 %s188_s5, 4  ;;  %s722_s7 = int_to_ptr.vmem [resolvable:$true] %s362_s7 }
  0x1a   : > { %s526_s11 = scalar_lea.vmem %s722_s7, 1024  ;;  %p533_p1 = scmp.lt.s32.totalorder %s722_s7, %s531_s19 }
  0x1b   : > { %226 = vperm.xlu1 %524, %v207_v4   ;;  %216 = vperm.xlu0 %523, %v205_v5   ;;  %p527_p12 = scmp.ne.s32.totalorder %s722_s7, %s526_s11  ;;  %p534_p2 = scmp.lt.s32.totalorder %s532_s21, %s526_s11 }
  0x1c   : > { %449 = vmatprep.subr.msk.mxu0 %vm244_vm0, %v230_v7  ;;  %462 = vmatprep.subr.msk.mxu1 %vm244_vm0, %v230_v7 }
  0x1d   : > { %450 = vmatpush1.msk.msra.mxu0 %vm244_vm0, %v208_v6  ;;  %463 = vmatpush1.msk.msra.mxu1 %vm244_vm0, %v208_v6  ;;  %p528_p13 = pnand %p527_p12, %p669_p4  ;;  %p535_p3 = por %p534_p2, %p533_p1 }
  0x1e   : > { %451 = vmatmul.mubr.msk.f32.vlgmr.msra.gmra.mxu0 %vm231_vm1, %v200_v8  ;;  %453 = vmatmul.mubr.msk.f32.vlgmr.msra.gmra.mxu1 %vm231_vm1, %v202_v9 }
  0x1f   : > { %319 = vmatprep.mubr.f32.mxu0 %v604_v0  ;;  %331 = vmatprep.mubr.f32.mxu1 %v604_v0  ;;  %p529_p0 = pneg %p528_p13 }
  0x21   : > { %p536_p5 = pnand %p535_p3, %p529_p0 }
  0x22   : > { %452 = vmatmul.mubr.msk.f32.gmra.mxu0 %vm231_vm1, %v201_v10  ;;  %454 = vmatmul.mubr.msk.f32.gmra.mxu1 %vm231_vm1, %v203_v11 }
  0x92   : > { %v222_v12 = vpop.permute.xlu1 %221  ;;  %v212_v13 = vpop.permute.xlu0 %211 }
  0x96   : > { %v227_v20 = vpop.permute.xlu1 %226  ;;  %v217_v21 = vpop.permute.xlu0 %216 }
  0xde   : > { %v315_v14 = vpop.f32.mrf.mxu0  ;;  %v327_v15 = vpop.f32.mrf.mxu1 }
  0xdf   : > { %v316_v16 = vadd.f32 %v315_v14, %v212_v13  ;;  %v328_v17 = vadd.f32 %v327_v15, %v222_v12 }
  0xe0   : > { %v317_v18 = vpop.f32.mrf.mxu0  ;;  %v329_v19 = vpop.f32.mrf.mxu1 }
  0xe1   : > { %338 = vst [vmem:[%s188_s5] sm:$0xff] %v316_v16  ;;  %342 = vst [vmem:[%s188_s5 + $0x20] sm:$0xff] %v328_v17  ;;  %v318_v22 = vadd.f32 %v317_v18, %v212_v13  ;;  %v330_v23 = vadd.f32 %v329_v19, %v222_v12 }
  0xe2   : > { %v321_v24 = vpop.f32.mrf.mxu0  ;;  %v333_v25 = vpop.f32.mrf.mxu1 }
  0xe3   : > { %339 = vst [vmem:[%s188_s5 + $0x8] sm:$0xff] %v318_v22  ;;  %343 = vst [vmem:[%s188_s5 + $0x28] sm:$0xff] %v330_v23  ;;  %v322_v26 = vadd.f32 %v321_v24, %v217_v21  ;;  %v334_v27 = vadd.f32 %v333_v25, %v227_v20 }
  0xe4   : > { %v323_v28 = vpop.f32.mrf.mxu0  ;;  %v335_v29 = vpop.f32.mrf.mxu1 }
  0xe5   : > { %340 = vst [vmem:[%s188_s5 + $0x10] sm:$0xff] %v322_v26  ;;  %344 = vst [vmem:[%s188_s5 + $0x30] sm:$0xff] %v334_v27  ;;  %v324_v30 = vadd.f32 %v323_v28, %v217_v21  ;;  %v336_v31 = vadd.f32 %v335_v29, %v227_v20 }
  0xe7   : > { %341 = vst [vmem:[%s188_s5 + $0x18] sm:$0xff] %v324_v30  ;;  %345 = vst [vmem:[%s188_s5 + $0x38] sm:$0xff] %v336_v31 }
  0xe8   : > { %539 = shalt.err (!%p536_p5)
}
  0xe9   : > { %s540_s23 = scalar_lea.hbm %s720_s10, 1024  ;;  %s544_s28 = scalar_lea.hbm %s774_s3, 2048 }
  0xea   : > { %p541_p6 = scmp.ne.s32.totalorder %s720_s10, %s540_s23  ;;  %p545_p10 = scmp.lt.s32.totalorder %s720_s10, %s774_s3 }
  0xeb   : > { %p546_p11 = scmp.lt.s32.totalorder %s544_s28, %s540_s23 }
  0xec   : > { %p542_p7 = pnand %p541_p6, %p669_p4 }
  0xed   : > { %p547_p12 = por %p546_p11, %p545_p10 }
  0xee   : > { %p543_p9 = pneg %p542_p7 }
  0xf0   : > { %p548_p13 = pnand %p547_p12, %p543_p9 }
  0xf2   : > { %551 = shalt.err (!%p548_p13)
}
  0xf3   : > { %s607_s4 = smov 256   ;;  %s608_s5 = smov 16  }
  0xf4   : > { %464 = dma.vmem_to_hbm [thread:$0]  (%p669_p4), %s722_s7, 1024, %s720_s10, %s726_s15, %s607_s4, %s607_s4, %s608_s5  }
  0xf5 PF: > { %p470_p0 = scmp.ge.s32.totalorder %s602_s17, 2  ;;  %s377_s6 = sand.u32 1, %s582_s12  }
  0xf6   : > { %s378_s8 = scalar_lea.sflag [#allocation3], %s377_s6 }
  0xf7   : > { %p467_p1 = pnand %p470_p0, %p676_p8 }
  0xf9   : > { %p468_p2 = pneg %p467_p1 }
  0xfb   : > { %577 = dma.done.wait (%p468_p2), %s378_s8, 1024  }
  0xfc   : > { %579 = vsyncadd (%p468_p2), %s378_s8, 4294966272  ;;  %s16_s17 = sadd.s32 1, %s602_s17   ;;  %s777_s12 = smov %s586_s13 }
  0xfd   : > { %p13_p3 = scmp.ge.s32.totalorder %s16_s17, 4   ;;  %s778_s13 = smov %s590_s14 }
  0xfe   : > { %s779_s14 = smov %s682_s25  ;;  %s780_s15 = smov %s598_s16 }
  0xff   : > { %s781_s16 = smov %s783_s20  ;;  %15 = sbr.rel (!%p13_p3) target bundleno = 4 (0x4), region = 67 }
 0x104   :  { %383 = vsyncpa [#allocation3], 1 }
 0x105   :  { %385 = vsyncpa [#allocation3 + $0x1], 1 }

</bundles_post_ra>
